<compile_context>
chip_gen: v7x
topology: tpu7x:2x2x1
jax: 0.10.0
libtpu: 0.0.40
codegen_flags: <defaults>
</compile_context>

<pallas_src>
import jax
import jax.numpy as jnp
from jax.experimental import pallas as pl
from jax.experimental.pallas import tpu as pltpu


def _round_up(n: int, m: int) -> int:
    return ((n + m - 1) // m) * m


def _largest_divisor_leq(n: int, cap: int) -> int:
    d = max(1, min(n, cap))
    while n % d:
        d -= 1
    return d


def _largest_aligned_divisor(n: int, align: int, cap: int) -> int:
    """Largest d with d | n, align | d, d <= cap (n must be a multiple of align)."""
    cap = max(align, min(n, cap))
    d = (cap // align) * align
    while d > align:
        if n % d == 0:
            return d
        d -= align
    return align


def residual_kernel(x_ref, w_ref, b_ref, o_ref):
    # x_ref / o_ref block: (Bt, Cp, tHW); w_ref: (Cp, Cp) folded weight; b_ref: (Cp, 1) f32.
    w = w_ref[...]                    # constant index_map -> stays VMEM-resident
    # Hoist the bias broadcast out of the per-sample loop (JAX does not CSE it).
    bb = jnp.broadcast_to(b_ref[...], (w_ref.shape[0], x_ref.shape[2]))
    bt = x_ref.shape[0]               # static, capped at <= 8 -> short unroll
    for s in range(bt):
        x = x_ref[s]                  # (Cp, tHW), activation dtype
        # (W + I) @ x on the MXU with f32 accumulation; bias fused on the output.
        y = jnp.dot(w, x, preferred_element_type=jnp.float32)
        o_ref[s] = (y + bb).astype(o_ref.dtype)


def residual_forward(x_nchw, conv_w, conv_b, *, target_block_bytes=None):
    """Residual(fn=1x1 Conv2d): out = conv1x1(x) + x.

    x_nchw: (N, C, H, W); conv_w: (C, C); conv_b: (C,).
    Works with f32 or bf16 activations (MXU accumulates in f32).
    """
    N, C, H, W = x_nchw.shape
    HW = H * W
    itemsize = jnp.dtype(x_nchw.dtype).itemsize

    # ---- Hardware-aware budgets -------------------------------------------
    try:
        vmem_cap = int(pltpu.get_tpu_info().vmem_capacity_bytes)
    except Exception:
        vmem_cap = 64 << 20                       # conservative (v7x-sized) fallback
    big_vmem = vmem_cap >= (96 << 20)             # v5e/v6e (128 MiB) vs v7x (64 MiB)
    if target_block_bytes is None:
        target_block_bytes = (8 << 20) if big_vmem else (6 << 20)

    # ---- Layout: sublane-align channels, lane-align spatial -----------------
    sublane = {4: 8, 2: 16, 1: 32}.get(itemsize, 8)
    C_pad = _round_up(C, sublane)
    HW_pad = _round_up(HW, 128)

    x = x_nchw.reshape(N, C, HW)
    if (C_pad, HW_pad) != (C, HW):
        x = jnp.pad(x, ((0, 0), (0, C_pad - C), (0, HW_pad - HW)))

    # Fold the residual add into the 1x1-conv weight: y = Wx + b + x = (W+I)x + b.
    w_fold = conv_w.astype(jnp.float32) + jnp.eye(C, dtype=jnp.float32)
    b_fold = conv_b.astype(jnp.float32).reshape(C, 1)
    if C_pad != C:
        w_fold = jnp.pad(w_fold, ((0, C_pad - C), (0, C_pad - C)))
        b_fold = jnp.pad(b_fold, ((0, C_pad - C), (0, 0)))
    w_fold = w_fold.astype(x.dtype)

    # ---- Tile sizes ----------------------------------------------------------
    # Spatial tile: 128-multiple; keep a single (C_pad, t_hw) slice <= ~2 MiB so
    # the f32 matmul temporary stays small (matters on v7x's 64 MiB VMEM).
    slice_cap = min(2 << 20, target_block_bytes)
    t_hw = _largest_aligned_divisor(
        HW_pad, 128, max(128, slice_cap // max(1, C_pad * itemsize)))

    # Batch a few samples per grid step (bounded unroll, <= 8); amortize step
    # overhead primarily through the lane tile, not the unroll.
    per_sample = C_pad * t_hw * itemsize
    bt_cap = min(8, max(1, target_block_bytes // max(1, per_sample)))
    bt = _largest_divisor_leq(N, bt_cap)

    grid_n, grid_hw = N // bt, HW_pad // t_hw
    # Keep >= 2 parallel grid steps when shapes allow (v7x has 2 TensorCores).
    if grid_n * grid_hw < 2 and t_hw > 128:
        t_hw = _largest_aligned_divisor(HW_pad, 128, t_hw // 2)
        grid_hw = HW_pad // t_hw
        per_sample = C_pad * t_hw * itemsize
    if grid_n * grid_hw < 2 and bt > 1:
        bt = _largest_divisor_leq(N, max(1, bt // 2))
        grid_n = N // bt
    grid = (grid_n, grid_hw)

    # ---- VMEM budget: 2x in + 2x out buffers + f32 temps + resident weights --
    block_bytes = bt * C_pad * t_hw * itemsize
    f32_tmp = C_pad * t_hw * 4
    w_bytes = C_pad * C_pad * itemsize + C_pad * 4
    need = 4 * block_bytes + 2 * f32_tmp + 2 * w_bytes + (2 << 20)
    vmem_limit = int(max(16 << 20, min(need, vmem_cap - (12 << 20))))

    act_idx = lambda i, j: (i, 0, j)

    out = pl.pallas_call(
        residual_kernel,
        out_shape=jax.ShapeDtypeStruct((N, C_pad, HW_pad), x.dtype),
        grid=grid,
        in_specs=[
            pl.BlockSpec((bt, C_pad, t_hw), act_idx),       # activations
            pl.BlockSpec((C_pad, C_pad), lambda i, j: (0, 0)),  # folded weight (resident)
            pl.BlockSpec((C_pad, 1), lambda i, j: (0, 0)),      # bias (resident)
        ],
        out_specs=pl.BlockSpec((bt, C_pad, t_hw), act_idx),
        compiler_params=pltpu.CompilerParams(
            dimension_semantics=("parallel", "parallel"),
            vmem_limit_bytes=vmem_limit,
        ),
    )(x, w_fold, b_fold)

    out = out[:, :C, :HW]
    return out.reshape(N, C, H, W)


def residual_reference(x_nchw, conv_w, conv_b):
    """Pure-JAX reference matching Residual(Conv2d(C, C, 1)): conv1x1(x) + x."""
    N, C, H, W = x_nchw.shape
    xf = x_nchw.astype(jnp.float32)
    y = jnp.einsum("oc,nchw->nohw", conv_w.astype(jnp.float32), xf)
    y = y + conv_b.astype(jnp.float32).reshape(1, C, 1, 1)
    return (y + xf).astype(x_nchw.dtype)


if __name__ == "__main__":
    N, C, H, W = 2, 4, 16, 16

    key = jax.random.PRNGKey(0)
    kx, kw, kb = jax.random.split(key, 3)

    x = jax.random.normal(kx, (N, C, H, W), dtype=jnp.float32)

    # fn = 1x1 Conv2d(C, C): deterministic random init.
    conv_w = jax.random.normal(kw, (C, C), dtype=jnp.float32) * 0.1
    conv_b = jax.random.normal(kb, (C,), dtype=jnp.float32) * 0.1

    out = residual_forward(x, conv_w, conv_b)
    out = jax.block_until_ready(out)

    ref = residual_reference(x, conv_w, conv_b)
    assert out.shape == (N, C, H, W)
    assert jnp.allclose(out, ref, atol=2e-4, rtol=2e-4), "mismatch vs reference"

    print("KERNEL_OK")
</pallas_src>

<mosaic_0001>
module attributes {stable_mosaic.version = 11 : i64} {
  func.func @residual_kernel(%arg0: i32, %arg1: i32, %arg2: memref<2x8x128xf32, #tpu.memory_space<vmem>>, %arg3: memref<8x8xf32, #tpu.memory_space<vmem>>, %arg4: memref<8x1xf32, #tpu.memory_space<vmem>>, %arg5: memref<2x8x128xf32, #tpu.memory_space<vmem>>) attributes {dimension_semantics = [#tpu.dimension_semantics<parallel>, #tpu.dimension_semantics<parallel>], iteration_bounds = array<i64: 1, 2>, scalar_prefetch = 0 : i64, scratch_operands = 0 : i64, tpu.core_type = #tpu.core_type<tc>, window_params = [{transform_indices = @transform_0, window_bounds = array<i64: 2, 8, 128>}, {pipeline_mode = #tpu.pipeline_mode<synchronous>, transform_indices = @transform_1, window_bounds = array<i64: 8, 8>}, {pipeline_mode = #tpu.pipeline_mode<synchronous>, transform_indices = @transform_2, window_bounds = array<i64: 8, 1>}, {transform_indices = @transform_3, window_bounds = array<i64: 2, 8, 128>}]} {
    %c0 = arith.constant 0 : index
    %c0_0 = arith.constant 0 : index
    %0 = vector.load %arg3[%c0, %c0_0] : memref<8x8xf32, #tpu.memory_space<vmem>>, vector<8x8xf32>
    %c0_1 = arith.constant 0 : index
    %c0_2 = arith.constant 0 : index
    %1 = vector.load %arg4[%c0_1, %c0_2] : memref<8x1xf32, #tpu.memory_space<vmem>>, vector<8x1xf32>
    %2 = vector.shape_cast %1 : vector<8x1xf32> to vector<8x1xf32>
    %3 = vector.broadcast %2 : vector<8x1xf32> to vector<8x128xf32>
    %c0_3 = arith.constant 0 : index
    %c0_4 = arith.constant 0 : index
    %c0_5 = arith.constant 0 : index
    %4 = vector.load %arg2[%c0_3, %c0_4, %c0_5] : memref<2x8x128xf32, #tpu.memory_space<vmem>>, vector<1x8x128xf32>
    %5 = vector.shape_cast %4 : vector<1x8x128xf32> to vector<8x128xf32>
    %cst = arith.constant dense<0.000000e+00> : vector<8x128xf32>
    %6 = tpu.matmul %0, %5, %cst {dimension_numbers = #tpu.dot_dimension_numbers<[1], [0], [0], [1], [0, 0, 1, 1], [], []>} : vector<8x8xf32>, vector<8x128xf32>, vector<8x128xf32> -> vector<8x128xf32>
    %7 = arith.addf %6, %3 : vector<8x128xf32>
    %c0_6 = arith.constant 0 : index
    %c0_7 = arith.constant 0 : index
    %c0_8 = arith.constant 0 : index
    %8 = vector.load %arg5[%c0_6, %c0_7, %c0_8] : memref<2x8x128xf32, #tpu.memory_space<vmem>>, vector<1x8x128xf32>
    %9 = vector.shape_cast %8 : vector<1x8x128xf32> to vector<8x128xf32>
    %10 = vector.shape_cast %7 : vector<8x128xf32> to vector<1x8x128xf32>
    tpu.vector_store %arg5[%c0_6, %c0_7, %c0_8], %10 {strides = array<i32>} : memref<2x8x128xf32, #tpu.memory_space<vmem>>, vector<1x8x128xf32>,
    %c1 = arith.constant 1 : index
    %c0_9 = arith.constant 0 : index
    %c0_10 = arith.constant 0 : index
    %11 = vector.load %arg2[%c1, %c0_9, %c0_10] : memref<2x8x128xf32, #tpu.memory_space<vmem>>, vector<1x8x128xf32>
    %12 = vector.shape_cast %11 : vector<1x8x128xf32> to vector<8x128xf32>
    %cst_11 = arith.constant dense<0.000000e+00> : vector<8x128xf32>
    %13 = tpu.matmul %0, %12, %cst_11 {dimension_numbers = #tpu.dot_dimension_numbers<[1], [0], [0], [1], [0, 0, 1, 1], [], []>} : vector<8x8xf32>, vector<8x128xf32>, vector<8x128xf32> -> vector<8x128xf32>
    %14 = arith.addf %13, %3 : vector<8x128xf32>
    %c1_12 = arith.constant 1 : index
    %c0_13 = arith.constant 0 : index
    %c0_14 = arith.constant 0 : index
    %15 = vector.load %arg5[%c1_12, %c0_13, %c0_14] : memref<2x8x128xf32, #tpu.memory_space<vmem>>, vector<1x8x128xf32>
    %16 = vector.shape_cast %15 : vector<1x8x128xf32> to vector<8x128xf32>
    %17 = vector.shape_cast %14 : vector<8x128xf32> to vector<1x8x128xf32>
    tpu.vector_store %arg5[%c1_12, %c0_13, %c0_14], %17 {strides = array<i32>} : memref<2x8x128xf32, #tpu.memory_space<vmem>>, vector<1x8x128xf32>,
    return
  }
  func.func @transform_0(%arg0: i32, %arg1: i32) -> (i32, i32, i32) {
    %c0_i32 = arith.constant 0 : i32
    %c0_i32_0 = arith.constant 0 : i32
    return %arg0, %c0_i32, %arg1 : i32, i32, i32
  }
  func.func @transform_1(%arg0: i32, %arg1: i32) -> (i32, i32) {
    %c0_i32 = arith.constant 0 : i32
    %c0_i32_0 = arith.constant 0 : i32
    %c0_i32_1 = arith.constant 0 : i32
    return %c0_i32, %c0_i32_0 : i32, i32
  }
  func.func @transform_2(%arg0: i32, %arg1: i32) -> (i32, i32) {
    %c0_i32 = arith.constant 0 : i32
    %c0_i32_0 = arith.constant 0 : i32
    %c0_i32_1 = arith.constant 0 : i32
    return %c0_i32, %c0_i32_0 : i32, i32
  }
  func.func @transform_3(%arg0: i32, %arg1: i32) -> (i32, i32, i32) {
    %c0_i32 = arith.constant 0 : i32
    %c0_i32_0 = arith.constant 0 : i32
    return %arg0, %c0_i32, %arg1 : i32, i32, i32
  }
}

</mosaic_0001>

<bundles_post_ra>
// kernel: tpu_custom_call.1
= control target key start
LH: loop header
LB: loop body
LE: loop exit
PB: predicated region body
PF: predicated region fallthrough
CT: control target
= control target key end

     0   :  { %8 = vsyncpa [#allocation3], 0  ;;  %s894_s0 = inlined_call_operand.hbm [shape: f32[2,8,256], index: 0, kind: input, shape index: {}]   ;;  %s895_s1 = inlined_call_operand.vmem [shape: f32[8,8], index: 1, kind: input, shape index: {}]   ;;  %s896_s2 = inlined_call_operand.vmem [shape: f32[8,1], index: 2, kind: input, shape index: {}]   ;;  %s897_s3 = inlined_call_operand.hbm [shape: f32[2,8,256], index: 3, kind: output, shape index: {}]  }
   0x1   :  { %10 = vsyncpa [#allocation3 + $0x1], 0 }
   0x2   :  { %11 = vsyncpa [#allocation4], 0 }
   0x3   :  { %13 = vsyncpa [#allocation4 + $0x1], 0  ;;  %s715_s12 = smov 0   ;;  %s717_s13 = smov 0  }
   0x4   :  { %s719_s14 = smov 0   ;;  %s721_s15 = smov 0  }
   0x5   :  { %s723_s16 = smov 0   ;;  %s725_s17 = smov 0  }
   0x6 LB: > { %s467_s18 = sadd.s32 4294967295, %s682_s17   ;;  %s468_s19 = sadd.s32 4294967294, %s682_s17   ;;  %s682_s17 = sphi %s725_s17, %s19_s17   ;;  %s678_s16 = sphi %s723_s16, %s911_s16   ;;  %s674_s15 = sphi %s721_s15, %s910_s15   ;;  %s670_s14 = sphi %s719_s14, %s909_s14   ;;  %s666_s13 = sphi %s717_s13, %s908_s13   ;;  %s662_s12 = sphi %s715_s12, %s907_s12  }
   0x7   : > { %s28_s20 = sadd.s32 1, %s678_s16  ;;  %s40_s21 = sadd.s32 1, %s670_s14 }
   0x8   : > { %p29_p0 = scmp.ge.s32.totalorder %s28_s20, 2  ;;  %p47_p1 = scmp.ne.s32.totalorder %s670_s14, %s666_s13 }
   0x9   : > { %p48_p2 = scmp.eq.s32.totalorder %s682_s17, 0  ;;  %p53_p3 = scmp.ne.s32.totalorder %s666_s13, %s662_s12 }
   0xa   : > { %s913_s20 = smov (%p29_p0, %s28_s20), 0  ;;  %p54_p5 = scmp.eq.s32.totalorder %s467_s18, 0 }
   0xb   : > { %p756_p4 = por %p48_p2, %p47_p1  ;;  %s36_s23 = ssub.s32 %s678_s16, %s913_s20 }
   0xc   : > { %p121_p6 = scmp.eq.s32.totalorder %s467_s18, 1  ;;  %p38_p7 = scmp.eq.s32.totalorder %s36_s23, 0 }
   0xd   : > { %p762_p8 = por %p54_p5, %p53_p3  ;;  %p127_p10 = scmp.eq.s32.totalorder %s468_s19, 1 }
   0xe   : > { %p766_p9 = por %p121_p6, %p47_p1  ;;  %p510_p13 = scmp.lt.s32.totalorder %s682_s17, 2 }
   0xf   : > { %s771_s26 = scalar_select %p38_p7, %s670_s14, %s40_s21  }
  0x10   : > { %s901_s25 = scalar_select %p766_p9, 1, 0 }
  0x11   : > { %p773_p11 = por %p127_p10, %p53_p3  ;;  %s153_s28 = sand.u32 1, %s670_s14  }
  0x12   : > { %s471_s29 = sshll.u32 %s153_s28, 4  ;;  %s472_s30 = sshll.u32 %s678_s16, 7 }
  0x13   : > { %s902_s27 = scalar_select %p773_p11, 1, 0 }
  0x14   : > { %s784_s6 = scalar_lea.hbm %s894_s0, %s472_s30  ;;  %s157_s7 = scalar_lea.vmem [#allocation2], %s471_s29 }
  0x15   : > { %s166_s8 = sshll.u32 %s157_s7, 4  ;;  %p790_p0 = pnand %p510_p13, %p756_p4  ;;  %s786_s8 = int_to_ptr.vmem [resolvable:$true] %s166_s8 }
  0x16   : > { %s794_s10 = scalar_lea.sflag [#allocation3], %s153_s28  ;;  %s570_s11 = scalar_lea.hbm %s784_s6, 256 }
  0x17   : > { %p571_p1 = scmp.ne.s32.totalorder %s784_s6, %s570_s11  ;;  %p572_p2 = pneg %p790_p0 }
  0x18   : > { %s575_s21 = scalar_lea.hbm %s894_s0, 512  ;;  %p576_p4 = scmp.lt.u32.totalorder %s784_s6, %s894_s0 }
  0x19   : > { %p573_p3 = pnand %p572_p2, %p571_p1  ;;  %p577_p6 = scmp.lt.u32.totalorder %s575_s21, %s570_s11 }
  0x1a   : > { %p579_p10 = scmp.lt.u32.totalorder %s570_s11, %s784_s6 }
  0x1b   : > { %p574_p5 = pneg %p573_p3  ;;  %p578_p7 = por %p577_p6, %p576_p4 }
  0x1d   : > { %p580_p13 = por %p579_p10, %p578_p7 }
  0x1f   : > { %p581_p12 = pnand %p580_p13, %p574_p5 }
  0x21   : > { %584 = shalt.err (!%p581_p12)
}
  0x22   : > { %s585_s28 = scalar_lea.vmem %s786_s8, 256  ;;  %s684_s29 = smov [#allocation2]  }
  0x23   : > { %p586_p1 = scmp.ne.s32.totalorder %s786_s8, %s585_s28  ;;  %s590_s30 = sshll.u32 %s684_s29, 4  ;;  %s591_s30 = int_to_ptr.vmem [resolvable:$false] %s590_s30 }
  0x24   : > { %s592_s4 = scalar_lea.vmem %s591_s30, 512  ;;  %p593_p9 = scmp.lt.s32.totalorder %s786_s8, %s591_s30 }
  0x25   : > { %p588_p3 = pnand %p586_p1, %p572_p2  ;;  %p594_p4 = scmp.lt.s32.totalorder %s592_s4, %s585_s28 }
  0x27   : > { %p589_p11 = pneg %p588_p3  ;;  %p595_p6 = por %p594_p4, %p593_p9 }
  0x29   : > { %p596_p7 = pnand %p595_p6, %p589_p11 }
  0x2b   : > { %599 = shalt.err (!%p596_p7)
}
  0x2c   : > { %s685_s5 = smov 256   ;;  %s686_s7 = smov 128  }
  0x2d   : > { %s687_s11 = smov 8   ;;  %p473_p12 = scmp.ge.s32.totalorder %s682_s17, 1 }
  0x2e   : > { %505 = dma.hbm_to_vmem [thread:$0]  (!%p790_p0), %s784_s6, 256, %s786_s8, %s794_s10, %s685_s5, %s686_s7, %s687_s11  }
  0x2f   : > { %p174_p2 = scmp.lt.s32.totalorder %s682_s17, 3 }
  0x31   : > { %p175_p5 = pnand %p473_p12, %p174_p2 }
  0x32   : > { %s825_s18 = sand.u32 (!%p175_p5), 1, %s666_s13  }
  0x33   : > { %178 = sbr.rel (%p175_p5) target bundleno = 294 (0x126), region = 32  ;;  %s474_s19 = sshll.u32 (!%p175_p5), %s825_s18, 4 }
  0x34   : > { %s181_s21 = scalar_lea.sflag (!%p175_p5), [#allocation3], %s825_s18  ;;  %s184_s22 = scalar_lea.vmem (!%p175_p5), [#allocation2], %s474_s19 }
  0x3a   : > { %653 = dma.done.wait (%p762_p8), %s181_s21, 256  }
  0x3b   : > { %655 = vsyncadd (%p762_p8), %s181_s21, 4294967040  ;;  %v688_v0 = vmov 0.0   ;;  %vm689_vm0 = vmmov 0   ;;  %v690_v1 = vmov 0   ;;  %vm217_vm1 = vcmask 64512   ;;  %v216_v2 = vld [vmem:[%s184_s22] sm:$0xff] }
  0x3c   : > { %488 = vmatprep.subr.mxu0 %v688_v0  ;;  %493 = vmatprep.subr.mxu1 %v688_v0  ;;  %v477_v3 = vld [vmem:[%s184_s22 + $0x8] sm:$0xff]  ;;  %v209_v4 = vld [vmem:[%s895_s1] sm:$0xff]  ;;  %s206_s10 = scalar_lea.vmem [#allocation5], %s474_s19  ;;  %s481_s28 = sshll.u32 %s674_s15, 7 }
  0x3d   : > { %490 = vmatprep.mubr.msk.f32.mxu0 %vm689_vm0, %v688_v0  ;;  %495 = vmatprep.mubr.msk.f32.mxu1 %vm689_vm0, %v688_v0  ;;  %v210_v5 = vld [vmem:[%s896_s2] sm:$0xff]  ;;  %s382_s23 = sshll.u32 %s206_s10, 4  ;;  %s845_s4 = scalar_lea.hbm %s897_s3, %s481_s28  ;;  %s840_s23 = int_to_ptr.vmem [resolvable:$true] %s382_s23 }
  0x3e   : > { %569 = vset.pattern.permute.xlu0 %v690_v1  ;;  %489 = vmatpush3.msra.mxu0 %v216_v2  ;;  %s367_s15 = scalar_lea.sflag [#allocation4], %s825_s18  ;;  %s600_s5 = scalar_lea.vmem %s840_s23, 256 }
  0x3f   : > { %494 = vmatpush3.msra.mxu1 %v477_v3  ;;  %491 = vmatmul.mubr.msk.f32.vlgmr.msra.gmra.mrb[0].mxu0 %vm217_vm1, %v209_v4  ;;  %p601_p8 = scmp.ne.s32.totalorder %s840_s23, %s600_s5  ;;  %p904_p9 = scmp.ne.s32.totalorder %s901_s25, 0 }
  0x40   : > { %496 = vmatmul.mubr.msk.f32.vlgmr.msra.gmra.mrb[0].mxu1 %vm217_vm1, %v209_v4  ;;  %213 = vperm.xlu0 %569, %v210_v5   ;;  %s691_s7 = smov [#allocation5]  }
  0x41   : > { %p602_p11 = pnand %p601_p8, %p904_p9  ;;  %s604_s11 = sshll.u32 %s691_s7, 4  ;;  %s605_s11 = int_to_ptr.vmem [resolvable:$false] %s604_s11 }
  0x42   : > { %s606_s19 = scalar_lea.vmem %s605_s11, 512  ;;  %p607_p10 = scmp.lt.s32.totalorder %s840_s23, %s605_s11 }
  0x43   : > { %p603_p0 = pneg %p602_p11  ;;  %p608_p13 = scmp.lt.s32.totalorder %s606_s19, %s600_s5 }
  0x45   : > { %p609_p1 = por %p608_p13, %p607_p10 }
  0x47   : > { %p610_p3 = pnand %p609_p1, %p603_p0 }
  0xbf   : > { %v214_v6 = vpop.permute.xlu0 %213 }
 0x112   : > { %v287_v7 = vpop.f32.mrb[0].mxu0 }
 0x113   : > { %v360_v8 = vpop.f32.mrb[0].mxu1  ;;  %v288_v9 = vadd.f32 %v287_v7, %v214_v6  ;;  %v492_v11 = vpop.f32.mrb[1].mxu0 }
 0x114   : > { %v361_v10 = vadd.f32 %v360_v8, %v214_v6  ;;  %v497_v12 = vpop.f32.mrb[1].mxu1 }
 0x115   : > { %291 = vst [vmem:[%s206_s10] sm:$0xff] %v288_v9 }
 0x116   : > { %479 = vst [vmem:[%s206_s10 + $0x8] sm:$0xff] %v361_v10 }
 0x117   : > { %613 = shalt.err (!%p610_p3)
}
 0x118   : > { %s614_s21 = scalar_lea.hbm %s845_s4, 256  ;;  %s618_s8 = scalar_lea.hbm %s897_s3, 512 }
 0x119   : > { %p615_p4 = scmp.ne.s32.totalorder %s845_s4, %s614_s21  ;;  %p619_p12 = scmp.lt.u32.totalorder %s845_s4, %s897_s3 }
 0x11a   : > { %p620_p2 = scmp.lt.u32.totalorder %s618_s8, %s614_s21  ;;  %p622_p8 = scmp.lt.u32.totalorder %s614_s21, %s845_s4 }
 0x11b   : > { %p616_p6 = pnand %p615_p4, %p904_p9 }
 0x11c   : > { %p621_p5 = por %p620_p2, %p619_p12 }
 0x11d   : > { %p617_p7 = pneg %p616_p6 }
 0x11e   : > { %p623_p11 = por %p622_p8, %p621_p5 }
 0x120   : > { %p624_p0 = pnand %p623_p11, %p617_p7 }
 0x122   : > { %627 = shalt.err (!%p624_p0)
}
 0x123   : > { %s692_s10 = smov 128   ;;  %s693_s28 = smov 256  }
 0x124   : > { %s694_s29 = smov 8  }
 0x125   : > { %500 = dma.vmem_to_hbm [thread:$0]  (%p904_p9), %s840_s23, 256, %s845_s4, %s367_s15, %s692_s10, %s693_s28, %s694_s29  }
 0x126 PF: > { %s397_s30 = sand.u32 1, %s662_s12   ;;  %p905_p10 = scmp.ne.s32.totalorder %s902_s27, 0 }
 0x127   : > { %p906_p13 = scmp.ge.s32.totalorder %s682_s17, 2  ;;  %s398_s5 = scalar_lea.sflag [#allocation4], %s397_s30 }
 0x129   : > { %p507_p1 = pnand %p906_p13, %p905_p10 }
 0x12b   : > { %657 = dma.done.wait (!%p507_p1), %s398_s5, 256  }
 0x12c   : > { %659 = vsyncadd (!%p507_p1), %s398_s5, 4294967040  ;;  %s19_s17 = sadd.s32 1, %s682_s17   ;;  %s907_s12 = smov %s666_s13 }
 0x12d   : > { %p16_p3 = scmp.ge.s32.totalorder %s19_s17, 4   ;;  %s908_s13 = smov %s670_s14 }
 0x12e   : > { %s909_s14 = smov %s771_s26  ;;  %s910_s15 = smov %s678_s16 }
 0x12f   : > { %s911_s16 = smov %s913_s20  ;;  %18 = sbr.rel (!%p16_p3) target bundleno = 6 (0x6), region = 79 }
 0x136   :  { %403 = vsyncpa [#allocation3], 1 }
 0x137   :  { %405 = vsyncpa [#allocation3 + $0x1], 1 }
 0x138   :  { %406 = vsyncpa [#allocation4], 1 }
 0x139   :  { %408 = vsyncpa [#allocation4 + $0x1], 1 }

</bundles_post_ra>
